<compile_context>
chip_gen: v5e
topology: v5e:2x2
jax: 0.10.0
libtpu: 0.0.40
codegen_flags: <defaults>
</compile_context>

<pallas_src>
import functools
import math

import jax
import jax.numpy as jnp
from jax.experimental import pallas as pl
from jax.experimental.pallas import tpu as pltpu


def _round_up(x, m):
    return (x + m - 1) // m * m


# ---------------------------------------------------------------------------
# Kernel 1: per row tile, h = X @ W and fused projection f = h @ [a1 | a2]
# ---------------------------------------------------------------------------
def _proj_kernel(x_ref, w_ref, a_ref, h_ref, f_ref):
    h = jnp.dot(x_ref[...], w_ref[...], preferred_element_type=jnp.float32)
    h_ref[...] = h
    # single narrow matmul producing both attention projections:
    #   f[:, 0] = h @ a1   (source term)     f[:, 1] = h @ a2   (neighbour term)
    f_ref[...] = jnp.dot(h, a_ref[...], preferred_element_type=jnp.float32)


# ---------------------------------------------------------------------------
# Kernel 2: online-softmax attention + aggregation + ELU
#   grid = (row tiles [parallel], neighbour tiles [arbitrary, last])
# ---------------------------------------------------------------------------
def _attn_kernel(f1_ref, f2_ref, adj_ref, h_ref, o_ref,
                 m_sc, l_sc, acc_sc, *, alpha):
    j = pl.program_id(1)

    @pl.when(j == 0)
    def _():
        m_sc[...] = jnp.full_like(m_sc, -jnp.inf)
        l_sc[...] = jnp.zeros_like(l_sc)
        acc_sc[...] = jnp.zeros_like(acc_sc)

    # logits for this (i, j) tile: e[p, q] = f1[p] + f2[q]
    e = f1_ref[...] + f2_ref[...]                       # (tile_m, tile_n)
    e = jnp.where(e > 0, e, alpha * e)                  # LeakyReLU(alpha)

    # adjacency mask (streamed as int8; widen on the VPU, compare, select)
    adj = adj_ref[...].astype(jnp.float32)
    e = jnp.where(adj > 0, e, jnp.float32(-9e15))

    # online softmax update (flash-attention style)
    m_cur = jnp.max(e, axis=1, keepdims=True)
    m_new = jnp.maximum(m_sc[...], m_cur)
    corr = jnp.exp(m_sc[...] - m_new)
    p = jnp.exp(e - m_new)                              # unnormalized probs
    l_sc[...] = corr * l_sc[...] + jnp.sum(p, axis=1, keepdims=True)
    # TODO(synk): on v6e/v7x cast p and the h tile to bf16 here (f32 accum) to
    #             double MXU feed; kept f32 for bit-tight correctness checking.
    acc_sc[...] = corr * acc_sc[...] + jnp.dot(
        p, h_ref[...], preferred_element_type=jnp.float32)
    m_sc[...] = m_new

    @pl.when(j == pl.num_programs(1) - 1)
    def _():
        # normalize AFTER aggregation: N*F_out multiplies instead of N^2,
        # divide goes to the otherwise-idle EUP slot.
        h_prime = acc_sc[...] * pl.reciprocal(l_sc[...], approx=True)
        o_ref[...] = jnp.where(h_prime > 0, h_prime, jnp.expm1(h_prime))  # ELU


# ---------------------------------------------------------------------------
# Wrapper
# ---------------------------------------------------------------------------
def gat_forward(x, w, a, adj, *, alpha, tile_m=128, tile_n=128):
    """Pallas GAT layer forward (concat=True, eval mode)."""
    n, f_in = x.shape
    f_out = w.shape[1]

    f_out_pad = _round_up(f_out, 128)                   # lane-dense features
    n_pad = _round_up(n, math.lcm(tile_m, tile_n))

    # zero-pad: padded feature cols of W give zero h cols (ELU(0)=0, sliced);
    # padded nodes are fully masked in adj and sliced from the output.
    x_p = jnp.zeros((n_pad, f_in), jnp.float32).at[:n, :].set(x)
    w_p = jnp.zeros((f_in, f_out_pad), jnp.float32).at[:, :f_out].set(w)
    a_stack = jnp.zeros((f_out_pad, 2), jnp.float32)
    a_stack = a_stack.at[:f_out, 0].set(a[:f_out, 0])
    a_stack = a_stack.at[:f_out, 1].set(a[f_out:2 * f_out, 0])
    adj_p = jnp.zeros((n_pad, n_pad), jnp.int8).at[:n, :n].set(
        (adj > 0).astype(jnp.int8))

    # ---- pass 1: h and attention projections (computed once, reused) -------
    h_pad, f = pl.pallas_call(
        _proj_kernel,
        out_shape=(jax.ShapeDtypeStruct((n_pad, f_out_pad), jnp.float32),
                   jax.ShapeDtypeStruct((n_pad, 2), jnp.float32)),
        grid=(n_pad // tile_m,),
        in_specs=[
            pl.BlockSpec((tile_m, f_in), lambda i: (i, 0)),
            pl.BlockSpec((f_in, f_out_pad), lambda i: (0, 0)),
            pl.BlockSpec((f_out_pad, 2), lambda i: (0, 0)),
        ],
        out_specs=(pl.BlockSpec((tile_m, f_out_pad), lambda i: (i, 0)),
                   pl.BlockSpec((tile_m, 2), lambda i: (i, 0))),
        compiler_params=pltpu.CompilerParams(
            dimension_semantics=("parallel",)),
    )(x_p, w_p, a_stack)

    f1 = f[:, 0:1]                        # (n_pad, 1) source-node term
    f2_row = f[:, 1].reshape(1, n_pad)    # (1, n_pad) neighbour term as a row

    # ---- pass 2: masked softmax attention + aggregation + ELU ---------------
    kernel = functools.partial(_attn_kernel, alpha=alpha)
    out_pad = pl.pallas_call(
        kernel,
        out_shape=jax.ShapeDtypeStruct((n_pad, f_out_pad), jnp.float32),
        grid=(n_pad // tile_m, n_pad // tile_n),
        in_specs=[
            pl.BlockSpec((tile_m, 1), lambda i, j: (i, 0)),        # f1
            pl.BlockSpec((1, tile_n), lambda i, j: (0, j)),        # f2 (row)
            pl.BlockSpec((tile_m, tile_n), lambda i, j: (i, j)),   # adj (int8)
            pl.BlockSpec((tile_n, f_out_pad), lambda i, j: (j, 0)),# h values
        ],
        out_specs=pl.BlockSpec((tile_m, f_out_pad), lambda i, j: (i, 0)),
        scratch_shapes=[
            pltpu.VMEM((tile_m, 1), jnp.float32),          # running max
            pltpu.VMEM((tile_m, 1), jnp.float32),          # running sum
            pltpu.VMEM((tile_m, f_out_pad), jnp.float32),  # accumulator
        ],
        compiler_params=pltpu.CompilerParams(
            dimension_semantics=("parallel", "arbitrary")),
    )(f1, f2_row, adj_p, h_pad)

    return out_pad[:n, :f_out]


# ---------------------------------------------------------------------------
# Reference & demo
# ---------------------------------------------------------------------------
def _xavier_uniform(key, shape, gain):
    fan_in, fan_out = shape[0], shape[1]
    bound = gain * jnp.sqrt(6.0 / (fan_in + fan_out))
    return jax.random.uniform(key, shape, jnp.float32, -bound, bound)


def _reference(x, w, a, adj, alpha):
    """Pure-JAX reference mirroring the PyTorch code (eval mode)."""
    h = x @ w
    n, f_out = h.shape
    a_input = jnp.concatenate(
        [jnp.repeat(h, n, axis=0), jnp.tile(h, (n, 1))], axis=1
    ).reshape(n, n, 2 * f_out)
    e = (a_input @ a).squeeze(2)
    e = jnp.where(e > 0, e, alpha * e)
    att = jnp.where(adj > 0, e, -9e15)
    att = jax.nn.softmax(att, axis=1)
    h_prime = att @ h
    return jnp.where(h_prime > 0, h_prime, jnp.expm1(h_prime))


if __name__ == "__main__":
    # small but tiling-exercising shapes: N pads 200->256 (2x2 attention grid),
    # F_out pads 64->128 (lane-dense output).
    N, F_IN, F_OUT = 200, 48, 64
    ALPHA = 0.2          # LeakyReLU negative slope
    DROPOUT = 0.5        # unused: eval-mode forward (see TODO above)

    key = jax.random.PRNGKey(0)
    k_w, k_a, k_x, k_adj = jax.random.split(key, 4)

    W = _xavier_uniform(k_w, (F_IN, F_OUT), gain=1.414)
    a = _xavier_uniform(k_a, (2 * F_OUT, 1), gain=1.414)
    x = jax.random.normal(k_x, (N, F_IN), jnp.float32)
    adj = (jax.random.uniform(k_adj, (N, N)) > 0.7).astype(jnp.float32)
    adj = adj.at[jnp.arange(N), jnp.arange(N)].set(1.0)   # self-loops

    out = gat_forward(x, W, a, adj, alpha=ALPHA)
    jax.block_until_ready(out)

    ref = _reference(x, W, a, adj, ALPHA)
    assert out.shape == (N, F_OUT)
    # tolerance accommodates the approx (EUP) reciprocal used for the softmax
    # denominator; genuine bugs produce O(1) errors.
    assert jnp.allclose(out, ref, atol=5e-3, rtol=5e-3), "mismatch vs reference"

    print("KERNEL_OK")
</pallas_src>

<mosaic_0001>
module attributes {stable_mosaic.version = 11 : i64} {
  func.func @_proj_kernel(%arg0: i32, %arg1: memref<128x48xf32, #tpu.memory_space<vmem>>, %arg2: memref<48x128xf32, #tpu.memory_space<vmem>>, %arg3: memref<128x2xf32, #tpu.memory_space<vmem>>, %arg4: memref<128x128xf32, #tpu.memory_space<vmem>>, %arg5: memref<128x2xf32, #tpu.memory_space<vmem>>) attributes {dimension_semantics = [#tpu.dimension_semantics<parallel>], iteration_bounds = array<i64: 2>, scalar_prefetch = 0 : i64, scratch_operands = 0 : i64, tpu.core_type = #tpu.core_type<tc>, window_params = [{transform_indices = @transform_0, window_bounds = array<i64: 128, 48>}, {pipeline_mode = #tpu.pipeline_mode<synchronous>, transform_indices = @transform_1, window_bounds = array<i64: 48, 128>}, {pipeline_mode = #tpu.pipeline_mode<synchronous>, transform_indices = @transform_2, window_bounds = array<i64: 128, 2>}, {transform_indices = @transform_3, window_bounds = array<i64: 128, 128>}, {transform_indices = @transform_4, window_bounds = array<i64: 128, 2>}]} {
    %c0 = arith.constant 0 : index
    %c0_0 = arith.constant 0 : index
    %0 = vector.load %arg1[%c0, %c0_0] : memref<128x48xf32, #tpu.memory_space<vmem>>, vector<128x48xf32>
    %c0_1 = arith.constant 0 : index
    %c0_2 = arith.constant 0 : index
    %1 = vector.load %arg2[%c0_1, %c0_2] : memref<48x128xf32, #tpu.memory_space<vmem>>, vector<48x128xf32>
    %cst = arith.constant dense<0.000000e+00> : vector<128x128xf32>
    %2 = tpu.matmul %0, %1, %cst {dimension_numbers = #tpu.dot_dimension_numbers<[1], [0], [0], [1], [0, 0, 1, 1], [], []>} : vector<128x48xf32>, vector<48x128xf32>, vector<128x128xf32> -> vector<128x128xf32>
    %c0_3 = arith.constant 0 : index
    %c0_4 = arith.constant 0 : index
    %3 = vector.load %arg4[%c0_3, %c0_4] : memref<128x128xf32, #tpu.memory_space<vmem>>, vector<128x128xf32>
    tpu.vector_store %arg4[%c0_3, %c0_4], %2 {strides = array<i32>} : memref<128x128xf32, #tpu.memory_space<vmem>>, vector<128x128xf32>,
    %c0_5 = arith.constant 0 : index
    %c0_6 = arith.constant 0 : index
    %4 = vector.load %arg3[%c0_5, %c0_6] : memref<128x2xf32, #tpu.memory_space<vmem>>, vector<128x2xf32>
    %cst_7 = arith.constant dense<0.000000e+00> : vector<128x2xf32>
    %5 = tpu.matmul %2, %4, %cst_7 {dimension_numbers = #tpu.dot_dimension_numbers<[1], [0], [0], [1], [0, 0, 1, 1], [], []>} : vector<128x128xf32>, vector<128x2xf32>, vector<128x2xf32> -> vector<128x2xf32>
    %c0_8 = arith.constant 0 : index
    %c0_9 = arith.constant 0 : index
    %6 = vector.load %arg5[%c0_8, %c0_9] : memref<128x2xf32, #tpu.memory_space<vmem>>, vector<128x2xf32>
    tpu.vector_store %arg5[%c0_8, %c0_9], %5 {strides = array<i32>} : memref<128x2xf32, #tpu.memory_space<vmem>>, vector<128x2xf32>,
    return
  }
  func.func @transform_0(%arg0: i32) -> (i32, i32) {
    %c0_i32 = arith.constant 0 : i32
    %c0_i32_0 = arith.constant 0 : i32
    return %arg0, %c0_i32 : i32, i32
  }
  func.func @transform_1(%arg0: i32) -> (i32, i32) {
    %c0_i32 = arith.constant 0 : i32
    %c0_i32_0 = arith.constant 0 : i32
    %c0_i32_1 = arith.constant 0 : i32
    return %c0_i32, %c0_i32_0 : i32, i32
  }
  func.func @transform_2(%arg0: i32) -> (i32, i32) {
    %c0_i32 = arith.constant 0 : i32
    %c0_i32_0 = arith.constant 0 : i32
    %c0_i32_1 = arith.constant 0 : i32
    return %c0_i32, %c0_i32_0 : i32, i32
  }
  func.func @transform_3(%arg0: i32) -> (i32, i32) {
    %c0_i32 = arith.constant 0 : i32
    %c0_i32_0 = arith.constant 0 : i32
    return %arg0, %c0_i32 : i32, i32
  }
  func.func @transform_4(%arg0: i32) -> (i32, i32) {
    %c0_i32 = arith.constant 0 : i32
    %c0_i32_0 = arith.constant 0 : i32
    return %arg0, %c0_i32 : i32, i32
  }
}

</mosaic_0001>

<bundles_post_ra>
// kernel: tpu_custom_call.1
= control target key start
LH: loop header
LB: loop body
LE: loop exit
PB: predicated region body
PF: predicated region fallthrough
CT: control target
= control target key end

     0   :  { %10 = vsyncpa [#allocation3], 0  ;;  %s1027_s0 = inlined_call_operand.vmem [shape: f32[256,48], index: 0, kind: input, shape index: {}]   ;;  %s1028_s1 = inlined_call_operand.vmem [shape: f32[48,128], index: 1, kind: input, shape index: {}]   ;;  %s1029_s2 = inlined_call_operand.vmem [shape: f32[128,2], index: 2, kind: input, shape index: {}]   ;;  %s1030_s3 = inlined_call_operand.hbm [shape: f32[256,128], index: 3, kind: output, shape index: {0}]   ;;  %s1031_s4 = inlined_call_operand.vmem [shape: f32[256,2], index: 4, kind: output, shape index: {1}]  }
   0x1   :  { %12 = vsyncpa [#allocation3 + $0x1], 0  ;;  %s776_s15 = smov 0   ;;  %s778_s16 = smov 0  }
   0x2   :  { %s780_s17 = smov 0   ;;  %s782_s18 = smov 0  }
   0x3 LB: > { %s797_s19 = sadd.s32 4294967295, %s747_s18   ;;  %s575_s20 = sadd.s32 4294967294, %s747_s18   ;;  %s747_s18 = sphi %s782_s18, %s1037_s18   ;;  %s743_s17 = sphi %s780_s17, %s1036_s17   ;;  %s739_s16 = sphi %s778_s16, %s1035_s16   ;;  %s735_s15 = sphi %s776_s15, %s1034_s15  }
   0x4   : > { %s801_s21 = sadd.s32 1, %s747_s18   ;;  %s93_s22 = sadd.s32 1, %s743_s17 }
   0x5   : > { %s90_s23 = ssub.s32 %s747_s18, %s801_s21  ;;  %p103_p0 = scmp.ne.s32.totalorder %s743_s17, %s739_s16 }
   0x6   : > { %p91_p1 = scmp.eq.s32.totalorder %s90_s23, 0  ;;  %p104_p2 = scmp.eq.s32.totalorder %s797_s19, 1 }
   0x7   : > { %p109_p3 = scmp.ne.s32.totalorder %s739_s16, %s735_s15  ;;  %p110_p4 = scmp.eq.s32.totalorder %s575_s20, 1 }
   0x8   : > { %s812_s24 = scalar_select %p91_p1, %s743_s17, %s93_s22  }
   0x9   : > { %p814_p5 = por %p104_p2, %p103_p0  ;;  %p818_p6 = por %p110_p4, %p109_p3 }
   0xa   : > { %p578_p7 = scmp.ge.s32.totalorder %s747_s18, 1  ;;  %p169_p8 = scmp.lt.s32.totalorder %s747_s18, 3 }
   0xc   : > { %p170_p9 = pnand %p578_p7, %p169_p8 }
   0xd   : > { %s580_s5 = sshll.u32 (!%p170_p9), %s797_s19, 4  ;;  %s190_s6 = sand.u32 (!%p170_p9), 1, %s739_s16  }
   0xe   : > { %173 = sbr.rel (%p170_p9) target bundleno = 394 (0x18a), region = 32  ;;  %p201_p10 = scmp.lt.s32.totalorder (!%p170_p9), %s580_s5, 31 }
   0xf   : > { %s579_s7 = sshll.u32 (!%p170_p9), %s190_s6, 7  ;;  %s605_s8 = sshll.u32 (!%p170_p9), %s797_s19, 7 }
  0x10   : > { %s480_s12 = scalar_lea.hbm (!%p170_p9), %s1030_s3, %s605_s8  ;;  %s464_s22 = scalar_lea.sflag (!%p170_p9), [#allocation3], %s190_s6 }
  0x11   : > { %s483_s14 = sshll.u32 (!%p170_p9), %s480_s12, 4  ;;  %s705_s19 = scalar_lea.hbm (!%p170_p9), %s1030_s3, 256  ;;  %s484_s14 = int_to_ptr.hbm [resolvable:$true] %s483_s14 }
  0x12   : > { %s699_s23 = sshra.s32 (!%p170_p9), %s484_s14, 4  ;;  %s700_s23 = int_to_ptr.hbm [resolvable:$true] %s699_s23 }
  0x13   : > { %v234_v0 = vld [vmem:[%s1028_s1 + $0x28] sm:$0xff]  ;;  %v233_v1 = vld [vmem:[%s1028_s1 + $0x20] sm:$0xff]  ;;  %v232_v2 = vld [vmem:[%s1028_s1 + $0x18] sm:$0xff]  ;;  %s1039_s5 = smov (!%p201_p10, %s580_s5), 31  ;;  %vm235_vm0 = vcmask 392192   ;;  %s701_s27 = scalar_lea.hbm %s700_s23, 128 }
  0x14   : > { %294 = vmatpush.msra.mxu0 %v234_v0  ;;  %606 = vmatpush.msra.mxu3 %v234_v0  ;;  %v231_v3 = vld [vmem:[%s1028_s1 + $0x10] sm:$0xff]  ;;  %s581_s10 = sshll.u32 %s1039_s5, 3  ;;  %v230_v4 = vld [vmem:[%s1028_s1 + $0x8] sm:$0xff]  ;;  %v229_v5 = vld [vmem:[%s1028_s1] sm:$0xff]  ;;  %p702_p11 = scmp.ne.s32.totalorder %s700_s23, %s701_s27 }
  0x15   : > { %s848_s20 = scalar_lea.vmem %s1027_s0, %s581_s10  ;;  %v380_v15 = vld [vmem:[%s1029_s2 + $0x78] sm:$0xff]  ;;  %v379_v16 = vld [vmem:[%s1029_s2 + $0x70] sm:$0xff]  ;;  %v378_v17 = vld [vmem:[%s1029_s2 + $0x68] sm:$0xff]  ;;  %p706_p0 = scmp.lt.s32.totalorder %s700_s23, %s1030_s3 }
  0x16   : > { %295 = vmatpush.msra.mxu0 %v233_v1  ;;  %607 = vmatpush.msra.mxu3 %v233_v1  ;;  %v213_v6 = vld [vmem:[%s848_s20] sm:$0xff]  ;;  %v214_v7 = vld [vmem:[%s848_s20 + $0x8] sm:$0xff]  ;;  %v215_v8 = vld [vmem:[%s848_s20 + $0x10] sm:$0xff]  ;;  %p703_p12 = pnand %p702_p11, %p814_p5  ;;  %p707_p1 = scmp.lt.s32.totalorder %s705_s19, %s701_s27 }
  0x17   : > { %v216_v9 = vld [vmem:[%s848_s20 + $0x18] sm:$0xff]  ;;  %v223_v10 = vld [vmem:[%s848_s20 + $0x50] sm:$0xff]  ;;  %v217_v11 = vld [vmem:[%s848_s20 + $0x20] sm:$0xff]  ;;  %381 = vmatpush.msra.mxu1 %v380_v15  ;;  %612 = vmatpush.msra.mxu2 %v380_v15 }
  0x18   : > { %296 = vmatpush.msra.mxu0 %v232_v2  ;;  %608 = vmatpush.msra.mxu3 %v232_v2  ;;  %v224_v12 = vld [vmem:[%s848_s20 + $0x58] sm:$0xff]  ;;  %v218_v13 = vld [vmem:[%s848_s20 + $0x28] sm:$0xff]  ;;  %v225_v14 = vld [vmem:[%s848_s20 + $0x60] sm:$0xff]  ;;  %p704_p13 = pneg %p703_p12  ;;  %p708_p2 = por %p707_p1, %p706_p0 }
  0x19   : > { %382 = vmatpush.msra.mxu1 %v379_v16  ;;  %614 = vmatpush.msra.mxu2 %v379_v16  ;;  %v219_v18 = vld [vmem:[%s848_s20 + $0x30] sm:$0xff]  ;;  %v377_v19 = vld [vmem:[%s1029_s2 + $0x60] sm:$0xff]  ;;  %v226_v20 = vld [vmem:[%s848_s20 + $0x68] sm:$0xff] }
  0x1a   : > { %297 = vmatpush.msra.mxu0 %v231_v3  ;;  %609 = vmatpush.msra.mxu3 %v231_v3  ;;  %v376_v21 = vld [vmem:[%s1029_s2 + $0x58] sm:$0xff]  ;;  %v375_v22 = vld [vmem:[%s1029_s2 + $0x50] sm:$0xff]  ;;  %v374_v23 = vld [vmem:[%s1029_s2 + $0x48] sm:$0xff]  ;;  %p709_p3 = pnand %p708_p2, %p704_p13 }
  0x1b   : > { %383 = vmatpush.msra.mxu1 %v378_v17  ;;  %616 = vmatpush.msra.mxu2 %v378_v17  ;;  %v220_v24 = vld [vmem:[%s848_s20 + $0x38] sm:$0xff]  ;;  %v373_v25 = vld [vmem:[%s1029_s2 + $0x40] sm:$0xff]  ;;  %v227_v26 = vld [vmem:[%s848_s20 + $0x70] sm:$0xff] }
  0x1c   : > { %298 = vmatpush.msra.mxu0 %v230_v4  ;;  %610 = vmatpush.msra.mxu3 %v230_v4  ;;  %v372_v27 = vld [vmem:[%s1029_s2 + $0x38] sm:$0xff]  ;;  %v371_v28 = vld [vmem:[%s1029_s2 + $0x30] sm:$0xff]  ;;  %v370_v29 = vld [vmem:[%s1029_s2 + $0x28] sm:$0xff] }
  0x1d   : > { %384 = vmatpush.msra.mxu1 %v377_v19  ;;  %618 = vmatpush.msra.mxu2 %v377_v19  ;;  %v221_v30 = vld [vmem:[%s848_s20 + $0x40] sm:$0xff]  ;;  %v228_v32 = vld [vmem:[%s848_s20 + $0x78] sm:$0xff]  ;;  %v367_v34 = vld [vmem:[%s1029_s2 + $0x10] sm:$0xff] }
  0x1e   : > { %299 = vmatpush.msra.mxu0 %v229_v5  ;;  %611 = vmatpush.msra.mxu3 %v229_v5  ;;  %v369_v31 = vld [vmem:[%s1029_s2 + $0x20] sm:$0xff]  ;;  %v368_v33 = vld [vmem:[%s1029_s2 + $0x18] sm:$0xff]  ;;  %v366_v35 = vld [vmem:[%s1029_s2 + $0x8] sm:$0xff] }
  0x1f   : > { %584 = vmatmul.msk.f32.vlgmr.msra.gmra.mxu0 %vm235_vm0, %v213_v6  ;;  %594 = vmatmul.msk.f32.vlgmr.msra.gmra.mxu3 %vm235_vm0, %v223_v10  ;;  %v222_v36 = vld [vmem:[%s848_s20 + $0x48] sm:$0xff]  ;;  %v365_v37 = vld [vmem:[%s1029_s2] sm:$0xff]  ;;  %s936_s20 = scalar_lea.vmem [#allocation2], %s579_s7 }
  0x20   : > { %613 = vmatpush.msrb.mxu3 %v380_v15  ;;  %385 = vmatpush.msra.mxu1 %v376_v21  ;;  %s481_s13 = sshll.u32 %s936_s20, 4  ;;  %s482_s13 = int_to_ptr.vmem [resolvable:$true] %s481_s13 }
  0x21   : > { %620 = vmatpush.msra.mxu2 %v376_v21 }
  0x22   : > { %615 = vmatpush.msrb.mxu3 %v379_v16  ;;  %386 = vmatpush.msra.mxu1 %v375_v22 }
  0x23   : > { %622 = vmatpush.msra.mxu2 %v375_v22 }
  0x24   : > { %617 = vmatpush.msrb.mxu3 %v378_v17  ;;  %387 = vmatpush.msra.mxu1 %v374_v23 }
  0x25   : > { %624 = vmatpush.msra.mxu2 %v374_v23 }
  0x26   : > { %619 = vmatpush.msrb.mxu3 %v377_v19  ;;  %388 = vmatpush.msra.mxu1 %v373_v25 }
  0x27   : > { %585 = vmatmul.msk.f32.gmra.mxu0 %vm235_vm0, %v214_v7  ;;  %595 = vmatmul.msk.f32.gmra.mxu3 %vm235_vm0, %v224_v12 }
  0x28   : > { %621 = vmatpush.msrb.mxu3 %v376_v21  ;;  %626 = vmatpush.msra.mxu2 %v373_v25 }
  0x29   : > { %389 = vmatpush.msra.mxu1 %v372_v27 }
  0x2a   : > { %623 = vmatpush.msrb.mxu3 %v375_v22  ;;  %628 = vmatpush.msra.mxu2 %v372_v27 }
  0x2b   : > { %390 = vmatpush.msra.mxu1 %v371_v28 }
  0x2c   : > { %625 = vmatpush.msrb.mxu3 %v374_v23  ;;  %630 = vmatpush.msra.mxu2 %v371_v28 }
  0x2d   : > { %391 = vmatpush.msra.mxu1 %v370_v29 }
  0x2e   : > { %627 = vmatpush.msrb.mxu3 %v373_v25  ;;  %632 = vmatpush.msra.mxu2 %v370_v29 }
  0x2f   : > { %586 = vmatmul.msk.f32.gmra.mxu0 %vm235_vm0, %v215_v8  ;;  %596 = vmatmul.msk.f32.gmra.mxu3 %vm235_vm0, %v225_v14 }
  0x30   : > { %629 = vmatpush.msrb.mxu3 %v372_v27  ;;  %392 = vmatpush.msra.mxu1 %v369_v31 }
  0x31   : > { %634 = vmatpush.msra.mxu2 %v369_v31 }
  0x32   : > { %393 = vmatpush.msra.mxu1 %v368_v33  ;;  %631 = vmatpush.msrb.mxu3 %v371_v28 }
  0x33   : > { %636 = vmatpush.msra.mxu2 %v368_v33 }
  0x34   : > { %394 = vmatpush.msra.mxu1 %v367_v34  ;;  %633 = vmatpush.msrb.mxu3 %v370_v29 }
  0x35   : > { %638 = vmatpush.msra.mxu2 %v367_v34 }
  0x36   : > { %395 = vmatpush.msra.mxu1 %v366_v35  ;;  %635 = vmatpush.msrb.mxu3 %v369_v31 }
  0x37   : > { %587 = vmatmul.msk.f32.gmra.mxu0 %vm235_vm0, %v216_v9  ;;  %597 = vmatmul.msk.f32.gmra.mxu3 %vm235_vm0, %v226_v20 }
  0x38   : > { %640 = vmatpush.msra.mxu2 %v366_v35  ;;  %637 = vmatpush.msrb.mxu3 %v368_v33 }
  0x39   : > { %396 = vmatpush.msra.mxu1 %v365_v37 }
  0x3a   : > { %639 = vmatpush.msrb.mxu3 %v367_v34  ;;  %642 = vmatpush.msra.mxu2 %v365_v37 }
  0x3c   : > { %641 = vmatpush.msrb.mxu3 %v366_v35 }
  0x3e   : > { %643 = vmatpush.msrb.mxu3 %v365_v37 }
  0x3f   : > { %588 = vmatmul.msk.f32.gmra.mxu0 %vm235_vm0, %v217_v11  ;;  %598 = vmatmul.msk.f32.gmra.mxu3 %vm235_vm0, %v227_v26 }
  0x47   : > { %589 = vmatmul.msk.f32.gmra.mxu0 %vm235_vm0, %v218_v13  ;;  %599 = vmatmul.msk.f32.gmra.mxu3 %vm235_vm0, %v228_v32 }
  0x4f   : > { %590 = vmatmul.msk.f32.gmra.mxu0 %vm235_vm0, %v219_v18 }
  0x57   : > { %591 = vmatmul.msk.f32.gmra.mxu0 %vm235_vm0, %v220_v24 }
  0x5f   : > { %592 = vmatmul.msk.f32.gmra.mxu0 %vm235_vm0, %v221_v30 }
  0x67   : > { %593 = vmatmul.msk.f32.gmra.mxu0 %vm235_vm0, %v222_v36 }
  0x9c   : > { %v301_v38 = vpop.f32.mrf.mxu0 }
  0x9d   : > { %349 = vst [vmem:[%s936_s20] sm:$0xff] %v301_v38  ;;  %397 = vmatmul.f32.vlgmr.msra.gmra.mxu1 %v301_v38 }
  0xa2   : > { %v331_v43 = vpop.f32.mrf.mxu3 }
  0xa3   : > { %359 = vst [vmem:[%s936_s20 + $0x50] sm:$0xff] %v331_v43 }
  0xa4   : > { %v304_v39 = vpop.f32.mrf.mxu0 }
  0xa5   : > { %350 = vst [vmem:[%s936_s20 + $0x8] sm:$0xff] %v304_v39  ;;  %400 = vmatmul.f32.gmra.mxu1 %v304_v39 }
  0xaa   : > { %v334_v45 = vpop.f32.mrf.mxu3 }
  0xab   : > { %360 = vst [vmem:[%s936_s20 + $0x58] sm:$0xff] %v334_v45 }
  0xac   : > { %v307_v40 = vpop.f32.mrf.mxu0 }
  0xad   : > { %351 = vst [vmem:[%s936_s20 + $0x10] sm:$0xff] %v307_v40  ;;  %403 = vmatmul.f32.gmra.mxu1 %v307_v40 }
  0xb2   : > { %v337_v47 = vpop.f32.mrf.mxu3 }
  0xb3   : > { %361 = vst [vmem:[%s936_s20 + $0x60] sm:$0xff] %v337_v47 }
  0xb4   : > { %v310_v41 = vpop.f32.mrf.mxu0 }
  0xb5   : > { %352 = vst [vmem:[%s936_s20 + $0x18] sm:$0xff] %v310_v41  ;;  %406 = vmatmul.f32.gmra.mxu1 %v310_v41 }
  0xba   : > { %v340_v49 = vpop.f32.mrf.mxu3 }
  0xbb   : > { %362 = vst [vmem:[%s936_s20 + $0x68] sm:$0xff] %v340_v49 }
  0xbc   : > { %v313_v42 = vpop.f32.mrf.mxu0 }
  0xbd   : > { %353 = vst [vmem:[%s936_s20 + $0x20] sm:$0xff] %v313_v42  ;;  %409 = vmatmul.f32.gmra.mxu1 %v313_v42 }
  0xc2   : > { %v343_v51 = vpop.f32.mrf.mxu3 }
  0xc3   : > { %439 = vmatmul.f32.vlgmr.msrb.gmra.mxu3 %v343_v51  ;;  %363 = vst [vmem:[%s936_s20 + $0x70] sm:$0xff] %v343_v51 }
  0xc4   : > { %v316_v44 = vpop.f32.mrf.mxu0 }
  0xc5   : > { %354 = vst [vmem:[%s936_s20 + $0x28] sm:$0xff] %v316_v44  ;;  %412 = vmatmul.f32.gmra.mxu1 %v316_v44 }
  0xca   : > { %v346_v53 = vpop.f32.mrf.mxu3 }
  0xcb   : > { %442 = vmatmul.f32.gmra.mxu3 %v346_v53  ;;  %364 = vst [vmem:[%s936_s20 + $0x78] sm:$0xff] %v346_v53 }
  0xcc   : > { %v319_v46 = vpop.f32.mrf.mxu0 }
  0xcd   : > { %355 = vst [vmem:[%s936_s20 + $0x30] sm:$0xff] %v319_v46  ;;  %415 = vmatmul.f32.gmra.mxu1 %v319_v46 }
  0xd4   : > { %v322_v48 = vpop.f32.mrf.mxu0 }
  0xd5   : > { %356 = vst [vmem:[%s936_s20 + $0x38] sm:$0xff] %v322_v48  ;;  %418 = vmatmul.f32.vlgmr.msra.gmra.mxu2 %v322_v48 }
  0xdc   : > { %v325_v50 = vpop.f32.mrf.mxu0 }
  0xdd   : > { %357 = vst [vmem:[%s936_s20 + $0x40] sm:$0xff] %v325_v50  ;;  %421 = vmatmul.f32.gmra.mxu2 %v325_v50 }
  0xe4   : > { %v328_v52 = vpop.f32.mrf.mxu0 }
  0xe5   : > { %358 = vst [vmem:[%s936_s20 + $0x48] sm:$0xff] %v328_v52  ;;  %424 = vmatmul.f32.gmra.mxu2 %v328_v52 }
  0xed   : > { %427 = vmatmul.f32.gmra.mxu2 %v331_v43 }
  0xf5   : > { %430 = vmatmul.f32.gmra.mxu2 %v334_v45 }
  0xfd   : > { %433 = vmatmul.f32.gmra.mxu2 %v337_v47 }
 0x105   : > { %436 = vmatmul.f32.gmra.mxu2 %v340_v49 }
 0x106   : > { %712 = shalt.err (!%p709_p3)
}
 0x107   : > { %s749_s6 = smov 128   ;;  %s750_s20 = smov 8   ;;  %vm446_vm1 = vcmask 15360  }
 0x108   : > { %644 = dma.vmem_to_hbm [thread:$0]  (%p814_p5), %s482_s13, 2048, %s484_s14, %s464_s22, %s749_s6, %s749_s6, %s750_s20  }
 0x109   : > { %s976_s11 = scalar_lea.vmem %s1031_s4, %s581_s10 }
 0x11a   : > { %v398_v54 = vpop.f32.mrf.mxu1 }
 0x11b   : > { %447 = vst.msk [vmem:[%s976_s11] sm:$0xff] %vm446_vm1, %v398_v54 }
 0x122   : > { %v401_v55 = vpop.f32.mrf.mxu1 }
 0x123   : > { %448 = vst.msk [vmem:[%s976_s11 + $0x8] sm:$0xff] %vm446_vm1, %v401_v55 }
 0x12a   : > { %v404_v56 = vpop.f32.mrf.mxu1 }
 0x12b   : > { %449 = vst.msk [vmem:[%s976_s11 + $0x10] sm:$0xff] %vm446_vm1, %v404_v56 }
 0x132   : > { %v407_v57 = vpop.f32.mrf.mxu1 }
 0x133   : > { %450 = vst.msk [vmem:[%s976_s11 + $0x18] sm:$0xff] %vm446_vm1, %v407_v57 }
 0x13a   : > { %v410_v58 = vpop.f32.mrf.mxu1 }
 0x13b   : > { %451 = vst.msk [vmem:[%s976_s11 + $0x20] sm:$0xff] %vm446_vm1, %v410_v58 }
 0x142   : > { %v413_v59 = vpop.f32.mrf.mxu1 }
 0x143   : > { %452 = vst.msk [vmem:[%s976_s11 + $0x28] sm:$0xff] %vm446_vm1, %v413_v59 }
 0x146   : > { %v440_v63 = vpop.f32.mrf.mxu3 }
 0x147   : > { %461 = vst.msk [vmem:[%s976_s11 + $0x70] sm:$0xff] %vm446_vm1, %v440_v63 }
 0x14a   : > { %v416_v60 = vpop.f32.mrf.mxu1 }
 0x14b   : > { %453 = vst.msk [vmem:[%s976_s11 + $0x30] sm:$0xff] %vm446_vm1, %v416_v60 }
 0x14e   : > { %v443_v1 = vpop.f32.mrf.mxu3 }
 0x14f   : > { %462 = vst.msk [vmem:[%s976_s11 + $0x78] sm:$0xff] %vm446_vm1, %v443_v1 }
 0x158   : > { %v419_v61 = vpop.f32.mrf.mxu2 }
 0x159   : > { %454 = vst.msk [vmem:[%s976_s11 + $0x38] sm:$0xff] %vm446_vm1, %v419_v61 }
 0x160   : > { %v422_v62 = vpop.f32.mrf.mxu2 }
 0x161   : > { %455 = vst.msk [vmem:[%s976_s11 + $0x40] sm:$0xff] %vm446_vm1, %v422_v62 }
 0x168   : > { %v425_v0 = vpop.f32.mrf.mxu2 }
 0x169   : > { %456 = vst.msk [vmem:[%s976_s11 + $0x48] sm:$0xff] %vm446_vm1, %v425_v0 }
 0x170   : > { %v428_v2 = vpop.f32.mrf.mxu2 }
 0x171   : > { %457 = vst.msk [vmem:[%s976_s11 + $0x50] sm:$0xff] %vm446_vm1, %v428_v2 }
 0x178   : > { %v431_v3 = vpop.f32.mrf.mxu2 }
 0x179   : > { %458 = vst.msk [vmem:[%s976_s11 + $0x58] sm:$0xff] %vm446_vm1, %v431_v3 }
 0x180   : > { %v434_v4 = vpop.f32.mrf.mxu2 }
 0x181   : > { %459 = vst.msk [vmem:[%s976_s11 + $0x60] sm:$0xff] %vm446_vm1, %v434_v4 }
 0x188   : > { %v437_v5 = vpop.f32.mrf.mxu2 }
 0x189   : > { %460 = vst.msk [vmem:[%s976_s11 + $0x68] sm:$0xff] %vm446_vm1, %v437_v5 }
 0x18a PF: > { %p650_p4 = scmp.ge.s32.totalorder %s747_s18, 2  ;;  %s502_s25 = sand.u32 1, %s735_s15  }
 0x18b   : > { %s503_s5 = scalar_lea.sflag [#allocation3], %s502_s25 }
 0x18c   : > { %p647_p5 = pnand %p650_p4, %p818_p6 }
 0x18e   : > { %p648_p7 = pneg %p647_p5 }
 0x190   : > { %730 = dma.done.wait (%p648_p7), %s503_s5, 2048  }
 0x191   : > { %732 = vsyncadd (%p648_p7), %s503_s5, 4294965248  ;;  %p15_p8 = scmp.ge.s32.totalorder %s801_s21, 4   ;;  %s1034_s15 = smov %s739_s16 }
 0x192   : > { %s1035_s16 = smov %s743_s17  ;;  %s1036_s17 = smov %s812_s24 }
 0x193   : > { %s1037_s18 = smov %s801_s21  ;;  %17 = sbr.rel (!%p15_p8) target bundleno = 3 (0x3), region = 79 }
 0x198   :  { %517 = vsyncpa [#allocation3], 1 }
 0x199   :  { %519 = vsyncpa [#allocation3 + $0x1], 1 }

</bundles_post_ra>
